<compile_context>
chip_gen: v6e
topology: v6e:2x2x1
jax: 0.10.0
libtpu: 0.0.40
codegen_flags: <defaults>
</compile_context>

<pallas_src>
import functools

import numpy as np
import jax
import jax.numpy as jnp
from jax.experimental import pallas as pl
from jax.experimental.pallas import tpu as pltpu


_LANE = 128
_SUBLANE = 8


def _round_up(v, m):
    return ((v + m - 1) // m) * m


# ---------------------------------------------------------------------------
# Fused Pallas kernel: 4 chained matmuls (+bias +activation), all in VMEM.
# ---------------------------------------------------------------------------

def _leaky_relu_f32(v):
    # For slope in (0,1): leaky_relu(v) == max(v, slope*v); no compare+select.
    return jnp.maximum(v, jnp.float32(0.01) * v)


def _encoder_kernel(x_ref, w1_ref, b1_ref, w2_ref, b2_ref,
                    w3_ref, b3_ref, w4_ref, b4_ref, o_ref):
    """Fused forward for one block of `block_b` samples.

    Matmul operands are bf16 (MXU native), accumulation is f32
    (preferred_element_type), epilogues (bias + leaky_relu / relu) are f32.
    Every feature dim is a 128-lane multiple (padded at prepare time), so all
    matmuls and VPU epilogues are full-lane; padded columns stay exactly zero.
    """
    h = x_ref[...].astype(jnp.bfloat16)                       # (block_b, C*H*W)

    # conv1 (+ folded input normalization) + leaky_relu
    h = jnp.dot(h, w1_ref[...], preferred_element_type=jnp.float32) + b1_ref[...]
    h = _leaky_relu_f32(h)

    # conv2 + leaky_relu (columns already in NCHW .view(B,-1) order)
    h = jnp.dot(h.astype(jnp.bfloat16), w2_ref[...],
                preferred_element_type=jnp.float32) + b2_ref[...]
    h = _leaky_relu_f32(h)

    # linear_1 + leaky_relu
    h = jnp.dot(h.astype(jnp.bfloat16), w3_ref[...],
                preferred_element_type=jnp.float32) + b3_ref[...]
    h = _leaky_relu_f32(h)

    # linear_2 + relu (output columns padded to 128 lanes, sliced in wrapper)
    h = jnp.dot(h.astype(jnp.bfloat16), w4_ref[...],
                preferred_element_type=jnp.float32) + b4_ref[...]
    o_ref[...] = jnp.maximum(h, jnp.float32(0.0))


# ---------------------------------------------------------------------------
# One-time weight preparation (runs once, outside the jitted step).
# ---------------------------------------------------------------------------

def _conv_to_dense(w_eff, h_in, w_in):
    """Lower a stride-2 3x3 (no padding) conv weight (Cout, Cin, 3, 3) to a
    dense matrix of shape (Cin*h_in*w_in, Cout*Ho*Wo); rows and columns in
    NCHW flatten order."""
    c_out, c_in, kh, kw = w_eff.shape
    h_out = (h_in - kh) // 2 + 1
    w_out = (w_in - kw) // 2 + 1
    sel_h = np.zeros((kh, h_in, h_out), np.float32)
    sel_w = np.zeros((kw, w_in, w_out), np.float32)
    for k in range(kh):
        for o in range(h_out):
            sel_h[k, 2 * o + k, o] = 1.0
    for k in range(kw):
        for o in range(w_out):
            sel_w[k, 2 * o + k, o] = 1.0
    dense = jnp.einsum('ocij,ihp,jwq->chwopq',
                       w_eff, jnp.asarray(sel_h), jnp.asarray(sel_w))
    return dense.reshape(c_in * h_in * w_in, c_out * h_out * w_out), h_out, w_out


def _vmem_budget_bytes():
    try:
        return int(pltpu.get_tpu_info().vmem_capacity_bytes) // 3
    except Exception:
        return 20 * 1024 * 1024     # conservative fallback


def prepare_params(params, config):
    """Fold normalize into conv1, lower convs to dense matmuls, pre-transpose
    the linear weights, zero-pad every feature dim to a 128-lane multiple,
    cast matmul operands to bf16. Called once."""
    C, H, W = config['channels'], config['height'], config['width']
    R = config['representation_size']

    mean = jnp.array([0.485, 0.456, 0.406] + [0.4] * (C - 3), jnp.float32)
    inv_std = 1.0 / jnp.array([0.229, 0.224, 0.225] + [0.225] * (C - 3), jnp.float32)

    # normalize(x) = (x - mean[c]) * inv_std[c]  folded into conv1:
    w1 = params['conv1_w'].astype(jnp.float32)
    w1_eff = w1 * inv_std[None, :, None, None]
    b1_eff = params['conv1_b'].astype(jnp.float32) - jnp.einsum(
        'ocij,c->o', w1, mean * inv_std)

    w1_dense, ho1, wo1 = _conv_to_dense(w1_eff, H, W)
    w2_dense, ho2, wo2 = _conv_to_dense(params['conv2_w'].astype(jnp.float32),
                                        ho1, wo1)

    dense_bytes = 2 * (int(w1_dense.size) + int(w2_dense.size))   # bf16 in-kernel
    if dense_bytes > _vmem_budget_bytes():
        # TODO(synk): replace the dense-conv lowering (O((H*W)^2) weights) by an
        # in-kernel 9-offset (kh,kw) accumulation path for large images.
        raise NotImplementedError(
            f"dense-conv lowering needs ~{dense_bytes / 2**20:.1f} MiB of VMEM "
            "for the conv weights; too large for this chip")

    b1_rep = jnp.repeat(b1_eff, ho1 * wo1)                         # (C1*Ho1*Wo1,)
    b2_rep = jnp.repeat(params['conv2_b'].astype(jnp.float32), ho2 * wo2)

    d1, d2 = w1_dense.shape[1], w2_dense.shape[1]
    d3 = 2 * R
    d1p, d2p, d3p, rp = (_round_up(d, _LANE) for d in (d1, d2, d3, R))

    def pad2(a, rows, cols):
        return jnp.pad(a, ((0, rows - a.shape[0]), (0, cols - a.shape[1])))

    def pad_row(b, cols):
        b = b.reshape(1, -1).astype(jnp.float32)
        return jnp.pad(b, ((0, 0), (0, cols - b.shape[1])))

    w3 = params['lin1_w'].astype(jnp.float32).T                    # (d2, 2R)
    w4 = params['lin2_w'].astype(jnp.float32).T                    # (2R, R)
    as_bf16 = lambda a: a.astype(jnp.bfloat16)

    return {
        'w1': as_bf16(pad2(w1_dense, w1_dense.shape[0], d1p)),
        'b1': pad_row(b1_rep, d1p),
        'w2': as_bf16(pad2(w2_dense, d1p, d2p)),
        'b2': pad_row(b2_rep, d2p),
        'w3': as_bf16(pad2(w3, d2p, d3p)),
        'b3': pad_row(params['lin1_b'], d3p),
        'w4': as_bf16(pad2(w4, d3p, rp)),
        'b4': pad_row(params['lin2_b'], rp),
    }


# ---------------------------------------------------------------------------
# Parameters + forward
# ---------------------------------------------------------------------------

def init_params(key, config):
    C = config['channels']
    K = config['num_keypoints']
    R = config['representation_size']
    Wd, Hd = config['width'], config['height']
    lin1_in = int(K * (Wd / 4 - 1) * (Hd / 4 - 1))   # matches the torch module
    ks = jax.random.split(key, 8)
    return {
        # torch.nn.init.normal_ on conv / linear weights; biases small random
        'conv1_w': jax.random.normal(ks[0], (2 * K, C, 3, 3), jnp.float32),
        'conv1_b': 0.01 * jax.random.normal(ks[1], (2 * K,), jnp.float32),
        'conv2_w': jax.random.normal(ks[2], (K, 2 * K, 3, 3), jnp.float32),
        'conv2_b': 0.01 * jax.random.normal(ks[3], (K,), jnp.float32),
        'lin1_w': jax.random.normal(ks[4], (2 * R, lin1_in), jnp.float32),
        'lin1_b': 0.01 * jax.random.normal(ks[5], (2 * R,), jnp.float32),
        'lin2_w': jax.random.normal(ks[6], (R, 2 * R), jnp.float32),
        'lin2_b': 0.01 * jax.random.normal(ks[7], (R,), jnp.float32),
    }


def _single_tensorcore_chip():
    """v5e / v6e have one TensorCore per chip: extra grid steps on small
    batches are pure serial overhead. v4/v5p (megacore) and v7x (2 TCs)
    benefit from >= 2 steps on a 'parallel' grid axis."""
    try:
        kind = jax.devices()[0].device_kind.lower()
    except Exception:
        return False
    return any(t in kind for t in ('v5 lite', 'v5e', 'v6 lite', 'v6e'))


def _choose_block_b(B, single_tc):
    if single_tc and B <= 512:
        return _round_up(B, _SUBLANE)                       # one grid step
    if B <= 1024:
        # >= 2 steps (shards across TCs / megacore) with minimal padded rows.
        return min(_round_up(pl.cdiv(B, 2), _SUBLANE), 512)
    # Large B: tallest tile that minimizes padded rows (amortizes weight
    # re-push and ~0.35us/step grid overhead on 256-wide MXU generations).
    cands = (512, 384, 256, 128)
    return min(cands, key=lambda c: (_round_up(B, c) - B, -c))


def representation_encoder_forward(x, prep, *, config):
    N, SF, KP, C, H, W = x.shape
    R = config['representation_size']
    B = N * SF * KP
    d_in = C * H * W

    # NCHW flatten of the raw images is a free view; normalization is folded
    # into w1/b1, so the input is touched exactly once (the kernel's DMA-in).
    # bf16 inputs are fed through untouched (halves input DMA bytes); the
    # cast-to-bf16 for the MXU happens inside the kernel either way.
    if x.dtype != jnp.bfloat16:
        x = x.astype(jnp.float32)                           # torch's x.float()
    x_flat = x.reshape(B, d_in)

    block_b = _choose_block_b(B, _single_tensorcore_chip())
    bp = _round_up(B, block_b)
    if bp != B:
        x_flat = jnp.pad(x_flat, ((0, bp - B), (0, 0)))

    d1p = prep['w1'].shape[1]
    d2p = prep['w2'].shape[1]
    d3p = prep['w3'].shape[1]
    rp = prep['w4'].shape[1]

    full = lambda a: pl.BlockSpec(a.shape, lambda i: (0,) * a.ndim)

    weight_bytes = sum(int(prep[k].size) * prep[k].dtype.itemsize
                       for k in ('w1', 'b1', 'w2', 'b2', 'w3', 'b3', 'w4', 'b4'))
    flops = 2 * bp * (d_in * d1p + d1p * d2p + d2p * d3p + d3p * rp)
    bytes_accessed = int(x_flat.size * x_flat.dtype.itemsize
                         + bp * rp * 4 + weight_bytes)

    # VMEM: double-buffered x/out blocks + (possibly double-buffered) weights
    # + slack for f32 intermediates.
    vmem_need = (2 * block_b * d_in * x_flat.dtype.itemsize
                 + 2 * block_b * rp * 4
                 + 2 * weight_bytes
                 + 4 * block_b * d1p * 4)
    vmem_limit = int(min(max(vmem_need * 1.25, 16 * 2**20), 96 * 2**20))

    out = pl.pallas_call(
        _encoder_kernel,
        out_shape=jax.ShapeDtypeStruct((bp, rp), jnp.float32),
        grid=(bp // block_b,),
        in_specs=[
            pl.BlockSpec((block_b, d_in), lambda i: (i, 0)),   # image rows: tiled
            full(prep['w1']), full(prep['b1']),                 # weights: VMEM-resident
            full(prep['w2']), full(prep['b2']),                 # (constant block index
            full(prep['w3']), full(prep['b3']),                 #  -> fetched once)
            full(prep['w4']), full(prep['b4']),
        ],
        out_specs=pl.BlockSpec((block_b, rp), lambda i: (i, 0)),
        compiler_params=pltpu.CompilerParams(
            dimension_semantics=("parallel",),                  # megacore / v7x 2-TC
            vmem_limit_bytes=vmem_limit),
        cost_estimate=pl.CostEstimate(flops=flops, transcendentals=0,
                                      bytes_accessed=bytes_accessed),
    )(x_flat, prep['w1'], prep['b1'], prep['w2'], prep['b2'],
      prep['w3'], prep['b3'], prep['w4'], prep['b4'])

    # Drop padded batch rows and padded output lanes.
    return out[:B, :R].reshape(N, SF, KP, R)


# ---------------------------------------------------------------------------
# Demo
# ---------------------------------------------------------------------------

if __name__ == "__main__":
    config = {
        'representation_size': 8,
        'num_keypoints': 4,
        'batch_norm': False,
        'width': 16,
        'height': 16,
        'channels': 3,
    }
    key = jax.random.PRNGKey(0)
    kx, kp = jax.random.split(key)

    N, SF, KP = 2, 2, 3
    x = jax.random.uniform(
        kx, (N, SF, KP, config['channels'], config['height'], config['width']),
        dtype=jnp.float32)

    params = init_params(kp, config)
    prep = prepare_params(params, config)     # one-time weight transform

    fwd = jax.jit(functools.partial(representation_encoder_forward, config=config))
    out = jax.block_until_ready(fwd(x, prep))

    assert out.shape == (N, SF, KP, config['representation_size']), out.shape
    assert out.dtype == jnp.float32
    assert bool(jnp.all(jnp.isfinite(out)))
    assert bool(jnp.all(out >= 0))            # final ReLU
    print("KERNEL_OK")
</pallas_src>

<mosaic_0001>
module attributes {stable_mosaic.version = 11 : i64} {
  func.func @_encoder_kernel(%arg0: i32, %arg1: memref<8x768xf32, #tpu.memory_space<vmem>>, %arg2: memref<768x512xbf16, #tpu.memory_space<vmem>>, %arg3: memref<1x512xf32, #tpu.memory_space<vmem>>, %arg4: memref<512x128xbf16, #tpu.memory_space<vmem>>, %arg5: memref<1x128xf32, #tpu.memory_space<vmem>>, %arg6: memref<128x128xbf16, #tpu.memory_space<vmem>>, %arg7: memref<1x128xf32, #tpu.memory_space<vmem>>, %arg8: memref<128x128xbf16, #tpu.memory_space<vmem>>, %arg9: memref<1x128xf32, #tpu.memory_space<vmem>>, %arg10: memref<8x128xf32, #tpu.memory_space<vmem>>) attributes {dimension_semantics = [#tpu.dimension_semantics<parallel>], iteration_bounds = array<i64: 2>, scalar_prefetch = 0 : i64, scratch_operands = 0 : i64, tpu.core_type = #tpu.core_type<tc>, window_params = [{transform_indices = @transform_0, window_bounds = array<i64: 8, 768>}, {pipeline_mode = #tpu.pipeline_mode<synchronous>, transform_indices = @transform_1, window_bounds = array<i64: 768, 512>}, {pipeline_mode = #tpu.pipeline_mode<synchronous>, transform_indices = @transform_2, window_bounds = array<i64: 1, 512>}, {pipeline_mode = #tpu.pipeline_mode<synchronous>, transform_indices = @transform_3, window_bounds = array<i64: 512, 128>}, {pipeline_mode = #tpu.pipeline_mode<synchronous>, transform_indices = @transform_4, window_bounds = array<i64: 1, 128>}, {pipeline_mode = #tpu.pipeline_mode<synchronous>, transform_indices = @transform_5, window_bounds = array<i64: 128, 128>}, {pipeline_mode = #tpu.pipeline_mode<synchronous>, transform_indices = @transform_6, window_bounds = array<i64: 1, 128>}, {pipeline_mode = #tpu.pipeline_mode<synchronous>, transform_indices = @transform_7, window_bounds = array<i64: 128, 128>}, {pipeline_mode = #tpu.pipeline_mode<synchronous>, transform_indices = @transform_8, window_bounds = array<i64: 1, 128>}, {transform_indices = @transform_9, window_bounds = array<i64: 8, 128>}]} {
    %c0 = arith.constant 0 : index
    %c0_0 = arith.constant 0 : index
    %0 = vector.load %arg1[%c0, %c0_0] : memref<8x768xf32, #tpu.memory_space<vmem>>, vector<8x768xf32>
    %1 = arith.truncf %0 : vector<8x768xf32> to vector<8x768xbf16>
    %c0_1 = arith.constant 0 : index
    %c0_2 = arith.constant 0 : index
    %2 = vector.load %arg2[%c0_1, %c0_2] : memref<768x512xbf16, #tpu.memory_space<vmem>>, vector<768x512xbf16>
    %cst = arith.constant dense<0.000000e+00> : vector<8x512xf32>
    %3 = tpu.matmul %1, %2, %cst {dimension_numbers = #tpu.dot_dimension_numbers<[1], [0], [0], [1], [0, 0, 1, 1], [], []>} : vector<8x768xbf16>, vector<768x512xbf16>, vector<8x512xf32> -> vector<8x512xf32>
    %c0_3 = arith.constant 0 : index
    %c0_4 = arith.constant 0 : index
    %4 = vector.load %arg3[%c0_3, %c0_4] : memref<1x512xf32, #tpu.memory_space<vmem>>, vector<1x512xf32>
    %5 = vector.broadcast %4 : vector<1x512xf32> to vector<8x512xf32>
    %6 = arith.addf %3, %5 : vector<8x512xf32>
    %cst_5 = arith.constant 0.00999999977 : f32
    %7 = vector.broadcast %cst_5 : f32 to vector<8x512xf32>
    %8 = arith.mulf %7, %6 : vector<8x512xf32>
    %9 = arith.maximumf %6, %8 : vector<8x512xf32>
    %10 = arith.truncf %9 : vector<8x512xf32> to vector<8x512xbf16>
    %c0_6 = arith.constant 0 : index
    %c0_7 = arith.constant 0 : index
    %11 = vector.load %arg4[%c0_6, %c0_7] : memref<512x128xbf16, #tpu.memory_space<vmem>>, vector<512x128xbf16>
    %cst_8 = arith.constant dense<0.000000e+00> : vector<8x128xf32>
    %12 = tpu.matmul %10, %11, %cst_8 {dimension_numbers = #tpu.dot_dimension_numbers<[1], [0], [0], [1], [0, 0, 1, 1], [], []>} : vector<8x512xbf16>, vector<512x128xbf16>, vector<8x128xf32> -> vector<8x128xf32>
    %c0_9 = arith.constant 0 : index
    %c0_10 = arith.constant 0 : index
    %13 = vector.load %arg5[%c0_9, %c0_10] : memref<1x128xf32, #tpu.memory_space<vmem>>, vector<1x128xf32>
    %14 = vector.broadcast %13 : vector<1x128xf32> to vector<8x128xf32>
    %15 = arith.addf %12, %14 : vector<8x128xf32>
    %cst_11 = arith.constant 0.00999999977 : f32
    %16 = vector.broadcast %cst_11 : f32 to vector<8x128xf32>
    %17 = arith.mulf %16, %15 : vector<8x128xf32>
    %18 = arith.maximumf %15, %17 : vector<8x128xf32>
    %19 = arith.truncf %18 : vector<8x128xf32> to vector<8x128xbf16>
    %c0_12 = arith.constant 0 : index
    %c0_13 = arith.constant 0 : index
    %20 = vector.load %arg6[%c0_12, %c0_13] : memref<128x128xbf16, #tpu.memory_space<vmem>>, vector<128x128xbf16>
    %cst_14 = arith.constant dense<0.000000e+00> : vector<8x128xf32>
    %21 = tpu.matmul %19, %20, %cst_14 {dimension_numbers = #tpu.dot_dimension_numbers<[1], [0], [0], [1], [0, 0, 1, 1], [], []>} : vector<8x128xbf16>, vector<128x128xbf16>, vector<8x128xf32> -> vector<8x128xf32>
    %c0_15 = arith.constant 0 : index
    %c0_16 = arith.constant 0 : index
    %22 = vector.load %arg7[%c0_15, %c0_16] : memref<1x128xf32, #tpu.memory_space<vmem>>, vector<1x128xf32>
    %23 = vector.broadcast %22 : vector<1x128xf32> to vector<8x128xf32>
    %24 = arith.addf %21, %23 : vector<8x128xf32>
    %cst_17 = arith.constant 0.00999999977 : f32
    %25 = vector.broadcast %cst_17 : f32 to vector<8x128xf32>
    %26 = arith.mulf %25, %24 : vector<8x128xf32>
    %27 = arith.maximumf %24, %26 : vector<8x128xf32>
    %28 = arith.truncf %27 : vector<8x128xf32> to vector<8x128xbf16>
    %c0_18 = arith.constant 0 : index
    %c0_19 = arith.constant 0 : index
    %29 = vector.load %arg8[%c0_18, %c0_19] : memref<128x128xbf16, #tpu.memory_space<vmem>>, vector<128x128xbf16>
    %cst_20 = arith.constant dense<0.000000e+00> : vector<8x128xf32>
    %30 = tpu.matmul %28, %29, %cst_20 {dimension_numbers = #tpu.dot_dimension_numbers<[1], [0], [0], [1], [0, 0, 1, 1], [], []>} : vector<8x128xbf16>, vector<128x128xbf16>, vector<8x128xf32> -> vector<8x128xf32>
    %c0_21 = arith.constant 0 : index
    %c0_22 = arith.constant 0 : index
    %31 = vector.load %arg9[%c0_21, %c0_22] : memref<1x128xf32, #tpu.memory_space<vmem>>, vector<1x128xf32>
    %32 = vector.broadcast %31 : vector<1x128xf32> to vector<8x128xf32>
    %33 = arith.addf %30, %32 : vector<8x128xf32>
    %cst_23 = arith.constant 0.000000e+00 : f32
    %34 = vector.broadcast %cst_23 : f32 to vector<8x128xf32>
    %35 = arith.maximumf %33, %34 : vector<8x128xf32>
    %c0_24 = arith.constant 0 : index
    %c0_25 = arith.constant 0 : index
    %36 = vector.load %arg10[%c0_24, %c0_25] : memref<8x128xf32, #tpu.memory_space<vmem>>, vector<8x128xf32>
    tpu.vector_store %arg10[%c0_24, %c0_25], %35 {strides = array<i32>} : memref<8x128xf32, #tpu.memory_space<vmem>>, vector<8x128xf32>,
    return
  }
  func.func @transform_0(%arg0: i32) -> (i32, i32) {
    %c0_i32 = arith.constant 0 : i32
    %c0_i32_0 = arith.constant 0 : i32
    return %arg0, %c0_i32 : i32, i32
  }
  func.func @transform_1(%arg0: i32) -> (i32, i32) {
    %c0_i32 = arith.constant 0 : i32
    %c0_i32_0 = arith.constant 0 : i32
    %c0_i32_1 = arith.constant 0 : i32
    return %c0_i32, %c0_i32_0 : i32, i32
  }
  func.func @transform_2(%arg0: i32) -> (i32, i32) {
    %c0_i32 = arith.constant 0 : i32
    %c0_i32_0 = arith.constant 0 : i32
    %c0_i32_1 = arith.constant 0 : i32
    return %c0_i32, %c0_i32_0 : i32, i32
  }
  func.func @transform_3(%arg0: i32) -> (i32, i32) {
    %c0_i32 = arith.constant 0 : i32
    %c0_i32_0 = arith.constant 0 : i32
    %c0_i32_1 = arith.constant 0 : i32
    return %c0_i32, %c0_i32_0 : i32, i32
  }
  func.func @transform_4(%arg0: i32) -> (i32, i32) {
    %c0_i32 = arith.constant 0 : i32
    %c0_i32_0 = arith.constant 0 : i32
    %c0_i32_1 = arith.constant 0 : i32
    return %c0_i32, %c0_i32_0 : i32, i32
  }
  func.func @transform_5(%arg0: i32) -> (i32, i32) {
    %c0_i32 = arith.constant 0 : i32
    %c0_i32_0 = arith.constant 0 : i32
    %c0_i32_1 = arith.constant 0 : i32
    return %c0_i32, %c0_i32_0 : i32, i32
  }
  func.func @transform_6(%arg0: i32) -> (i32, i32) {
    %c0_i32 = arith.constant 0 : i32
    %c0_i32_0 = arith.constant 0 : i32
    %c0_i32_1 = arith.constant 0 : i32
    return %c0_i32, %c0_i32_0 : i32, i32
  }
  func.func @transform_7(%arg0: i32) -> (i32, i32) {
    %c0_i32 = arith.constant 0 : i32
    %c0_i32_0 = arith.constant 0 : i32
    %c0_i32_1 = arith.constant 0 : i32
    return %c0_i32, %c0_i32_0 : i32, i32
  }
  func.func @transform_8(%arg0: i32) -> (i32, i32) {
    %c0_i32 = arith.constant 0 : i32
    %c0_i32_0 = arith.constant 0 : i32
    %c0_i32_1 = arith.constant 0 : i32
    return %c0_i32, %c0_i32_0 : i32, i32
  }
  func.func @transform_9(%arg0: i32) -> (i32, i32) {
    %c0_i32 = arith.constant 0 : i32
    %c0_i32_0 = arith.constant 0 : i32
    return %arg0, %c0_i32 : i32, i32
  }
}

</mosaic_0001>

<bundles_post_ra>
// kernel: representation_encoder_forward.1
= control target key start
LH: loop header
LB: loop body
LE: loop exit
PB: predicated region body
PF: predicated region fallthrough
CT: control target
= control target key end

     0   :  { %14 = vsyncpa [#allocation3], 0  ;;  %s3238_s30 = smov 0   ;;  %s3487_s0 = inlined_call_operand.vmem [shape: f32[16,768], index: 0, kind: input, shape index: {}]   ;;  %s3488_s1 = inlined_call_operand.hbm [shape: bf16[768,512], index: 1, kind: input, shape index: {}]   ;;  %s3489_s2 = inlined_call_operand.vmem [shape: f32[1,512], index: 2, kind: input, shape index: {}]   ;;  %s3490_s3 = inlined_call_operand.vmem [shape: bf16[512,128], index: 3, kind: input, shape index: {}]   ;;  %s3491_s4 = inlined_call_operand.vmem [shape: f32[1,128], index: 4, kind: input, shape index: {}]   ;;  %s3492_s5 = inlined_call_operand.vmem [shape: bf16[128,128], index: 5, kind: input, shape index: {}]   ;;  %s3493_s6 = inlined_call_operand.vmem [shape: f32[1,128], index: 6, kind: input, shape index: {}]   ;;  %s3494_s7 = inlined_call_operand.vmem [shape: bf16[128,128], index: 7, kind: input, shape index: {}]   ;;  %s3495_s8 = inlined_call_operand.vmem [shape: f32[1,128], index: 8, kind: input, shape index: {}]   ;;  %s3496_s9 = inlined_call_operand.vmem [shape: f32[16,128], index: 9, kind: output, shape index: {}]  }
   0x1 LB: > { %s3244_s10 = sadd.s32 4294967295, %s3181_s30   ;;  %p2431_p0 = scmp.ge.s32.totalorder %s3181_s30, 1  ;;  %s3181_s30 = sphi %s3238_s30, %s20_s30  }
   0x2   : > { %p245_p1 = scmp.lt.s32.totalorder %s3181_s30, 3  ;;  %s3183_s11 = smov [#allocation2]  }
   0x3   : > { %s257_s12 = sshll.u32 %s3183_s11, 4  ;;  %p2794_p3 = scmp.eq.s32.totalorder %s3244_s10, 0  ;;  %s258_s12 = int_to_ptr.vmem [resolvable:$true] %s257_s12 }
   0x4   : > { %p3248_p2 = pnand %p2431_p0, %p245_p1  ;;  %s3156_s14 = scalar_lea.vmem %s258_s12, 24576 }
   0x5   : > { %p3157_p7 = scmp.ne.s32.totalorder %s258_s12, %s3156_s14  ;;  %p3164_p10 = scmp.lt.s32.totalorder %s258_s12, %s258_s12 }
   0x6   : > { %p2790_p4 = pneg %p3248_p2  ;;  %p3165_p11 = scmp.lt.s32.totalorder %s3156_s14, %s3156_s14 }
   0x8   : > { %p2791_p5 = pnand %p2794_p3, %p2790_p4  ;;  %p3166_p12 = por %p3165_p11, %p3164_p10 }
   0xa   : > { %p3147_p6 = pneg %p2791_p5 }
   0xc   : > { %p3159_p8 = pnand %p3157_p7, %p3147_p6 }
   0xe   : > { %p3160_p9 = pneg %p3159_p8 }
  0x10   : > { %p3167_p13 = pnand %p3166_p12, %p3160_p9 }
  0x12   : > { %3170 = shalt.err (!%p3167_p13)
}
  0x13   : > { %s3184_s15 = smov 256   ;;  %s3185_s16 = smov 16  }
  0x14   : > { %2793 = dma.hbm_to_vmem [thread:$0]  (!%p2791_p5), %s3488_s1, 24576, %s258_s12, [#allocation3], %s3184_s15, %s3184_s15, %s3185_s16  }
  0x15   : > { %302 = sbr.rel (%p3248_p2) target bundleno = 1031 (0x407), region = 56 }
  0x1a   : > { %3176 = dma.done.wait (%p2794_p3), [#allocation3], 24576  }
  0x1b   : > { %3178 = vsyncadd (%p2794_p3), [#allocation3], 4294942720  ;;  %v2809_v0 = vld [vmem:[#allocation2 + $0xe4] ss:$16 sps:$4 sm:$0xff]   ;;  %v2813_v2 = vld [vmem:[#allocation2 + $0xe0] ss:$16 sps:$4 sm:$0xff]  }
  0x1c   : > { %v2811_v1 = vld [vmem:[#allocation2 + $0x2e4] ss:$16 sps:$4 sm:$0xff]   ;;  %1533 = vmatprep.subr.bf16.mxu0 %v2809_v0  ;;  %v2814_v3 = vld [vmem:[#allocation2 + $0x2e0] ss:$16 sps:$4 sm:$0xff]   ;;  %p337_p0 = scmp.lt.s32.totalorder %s3244_s10, 1  ;;  %vm3187_vm0 = vmmov 0  }
  0x1d   : > { %1574 = vmatprep.subr.bf16.mxu1 %v2811_v1  ;;  %v2815_v4 = vld [vmem:[#allocation2 + $0xc4] ss:$16 sps:$4 sm:$0xff]   ;;  %1534 = vmatpush1.bf16.msra.mxu0 %v2813_v2  ;;  %v2819_v6 = vld [vmem:[#allocation2 + $0xc0] ss:$16 sps:$4 sm:$0xff]  }
  0x1e   : > { %1575 = vmatpush1.bf16.msra.mxu1 %v2814_v3  ;;  %v2817_v5 = vld [vmem:[#allocation2 + $0x2c4] ss:$16 sps:$4 sm:$0xff]   ;;  %1535 = vmatprep.subr.bf16.mxu0 %v2815_v4  ;;  %v2820_v7 = vld [vmem:[#allocation2 + $0x2c0] ss:$16 sps:$4 sm:$0xff]   ;;  %s3499_s10 = smov (!%p337_p0, %s3244_s10), 1 }
  0x1f   : > { %1576 = vmatprep.subr.bf16.mxu1 %v2817_v5  ;;  %v2821_v8 = vld [vmem:[#allocation2 + $0xa4] ss:$16 sps:$4 sm:$0xff]   ;;  %v2825_v10 = vld [vmem:[#allocation2 + $0xa0] ss:$16 sps:$4 sm:$0xff]   ;;  %s2785_s19 = smul.u32 48, %s3499_s10  ;;  %s2437_s13 = sshll.u32 %s3499_s10, 3 }
  0x20   : > { %v2823_v9 = vld [vmem:[#allocation2 + $0x2a4] ss:$16 sps:$4 sm:$0xff]   ;;  %v2826_v11 = vld [vmem:[#allocation2 + $0x2a0] ss:$16 sps:$4 sm:$0xff]   ;;  %s345_s16 = scalar_lea.vmem %s3496_s9, %s2437_s13 }
  0x21   : > { %1536 = vmatpush1.bf16.msra.mxu0 %v2819_v6  ;;  %v2827_v12 = vld [vmem:[#allocation2 + $0x84] ss:$16 sps:$4 sm:$0xff]   ;;  %v2831_v14 = vld [vmem:[#allocation2 + $0x80] ss:$16 sps:$4 sm:$0xff]   ;;  %s3274_s22 = scalar_lea.vmem %s3487_s0, %s2785_s19 }
  0x22   : > { %1577 = vmatpush1.bf16.msra.mxu1 %v2820_v7  ;;  %1537 = vmatprep.subr.bf16.mxu0 %v2821_v8  ;;  %v2829_v13 = vld [vmem:[#allocation2 + $0x284] ss:$16 sps:$4 sm:$0xff]   ;;  %v2832_v15 = vld [vmem:[#allocation2 + $0x280] ss:$16 sps:$4 sm:$0xff]   ;;  %v348_v46 = vld [vmem:[%s3274_s22 + $0x8] sm:$0xff] }
  0x23   : > { %1578 = vmatprep.subr.bf16.mxu1 %v2823_v9  ;;  %v2833_v16 = vld [vmem:[#allocation2 + $0x64] ss:$16 sps:$4 sm:$0xff]   ;;  %v2837_v18 = vld [vmem:[#allocation2 + $0x60] ss:$16 sps:$4 sm:$0xff]   ;;  %v3277_v49 = vpack.c.bf16 %v348_v46, %v348_v46  ;;  %v350_v50 = vld [vmem:[%s3274_s22 + $0x18] sm:$0xff] }
  0x24   : > { %v2835_v17 = vld [vmem:[#allocation2 + $0x264] ss:$16 sps:$4 sm:$0xff]   ;;  %v2838_v19 = vld [vmem:[#allocation2 + $0x260] ss:$16 sps:$4 sm:$0xff]   ;;  %v3280_v52 = vpack.c.bf16 %v350_v50, %v350_v50  ;;  %v2910_v7 = vld [vmem:[#allocation2 + $0xec] ss:$16 sps:$4 sm:$0xff]  }
  0x25   : > { %1538 = vmatpush1.bf16.msra.mxu0 %v2825_v10  ;;  %v2839_v20 = vld [vmem:[#allocation2 + $0x44] ss:$16 sps:$4 sm:$0xff]   ;;  %v2843_v22 = vld [vmem:[#allocation2 + $0x40] ss:$16 sps:$4 sm:$0xff]   ;;  %1565 = vmatprep.mubr.bf16.mxu0 %v3277_v49 }
  0x26   : > { %1579 = vmatpush1.bf16.msra.mxu1 %v2826_v11  ;;  %1539 = vmatprep.subr.bf16.mxu0 %v2827_v12  ;;  %v2841_v21 = vld [vmem:[#allocation2 + $0x244] ss:$16 sps:$4 sm:$0xff]   ;;  %v2844_v23 = vld [vmem:[#allocation2 + $0x240] ss:$16 sps:$4 sm:$0xff]   ;;  %v2908_v11 = vld [vmem:[#allocation2 + $0xe8] ss:$16 sps:$4 sm:$0xff]  }
  0x27   : > { %1580 = vmatprep.subr.bf16.mxu1 %v2829_v13  ;;  %v2845_v24 = vld [vmem:[#allocation2 + $0x24] ss:$16 sps:$4 sm:$0xff]   ;;  %v2849_v26 = vld [vmem:[#allocation2 + $0x20] ss:$16 sps:$4 sm:$0xff]   ;;  %1606 = vmatprep.mubr.bf16.mxu1 %v3280_v52  ;;  %v2916_v13 = vld [vmem:[#allocation2 + $0xcc] ss:$16 sps:$4 sm:$0xff]  }
  0x28   : > { %v2847_v25 = vld [vmem:[#allocation2 + $0x224] ss:$16 sps:$4 sm:$0xff]   ;;  %v2850_v27 = vld [vmem:[#allocation2 + $0x220] ss:$16 sps:$4 sm:$0xff]  }
  0x29   : > { %1540 = vmatpush1.bf16.msra.mxu0 %v2831_v14  ;;  %v2851_v28 = vld [vmem:[#allocation2 + $0x4] ss:$16 sps:$4 sm:$0xff]   ;;  %v2855_v30 = vld [vmem:[#allocation2] ss:$16 sps:$4 sm:$0xff]  }
  0x2a   : > { %1581 = vmatpush1.bf16.msra.mxu1 %v2832_v15  ;;  %1541 = vmatprep.subr.bf16.mxu0 %v2833_v16  ;;  %v2853_v29 = vld [vmem:[#allocation2 + $0x204] ss:$16 sps:$4 sm:$0xff]   ;;  %v2856_v31 = vld [vmem:[#allocation2 + $0x200] ss:$16 sps:$4 sm:$0xff]   ;;  %v2914_v15 = vld [vmem:[#allocation2 + $0xc8] ss:$16 sps:$4 sm:$0xff]  }
  0x2b   : > { %1582 = vmatprep.subr.bf16.mxu1 %v2835_v17  ;;  %v2857_v32 = vld [vmem:[#allocation2 + $0x1e4] ss:$16 sps:$4 sm:$0xff]   ;;  %v2861_v34 = vld [vmem:[#allocation2 + $0x1e0] ss:$16 sps:$4 sm:$0xff]   ;;  %v2922_v17 = vld [vmem:[#allocation2 + $0xac] ss:$16 sps:$4 sm:$0xff]  }
  0x2c   : > { %v2859_v33 = vld [vmem:[#allocation2 + $0x3e4] ss:$16 sps:$4 sm:$0xff]   ;;  %v2862_v35 = vld [vmem:[#allocation2 + $0x3e0] ss:$16 sps:$4 sm:$0xff]  }
  0x2d   : > { %1542 = vmatpush1.bf16.msra.mxu0 %v2837_v18  ;;  %v2863_v36 = vld [vmem:[#allocation2 + $0x1c4] ss:$16 sps:$4 sm:$0xff]   ;;  %v2867_v38 = vld [vmem:[#allocation2 + $0x1c0] ss:$16 sps:$4 sm:$0xff]  }
  0x2e   : > { %1583 = vmatpush1.bf16.msra.mxu1 %v2838_v19  ;;  %1543 = vmatprep.subr.bf16.mxu0 %v2839_v20  ;;  %v2865_v37 = vld [vmem:[#allocation2 + $0x3c4] ss:$16 sps:$4 sm:$0xff]   ;;  %v2868_v39 = vld [vmem:[#allocation2 + $0x3c0] ss:$16 sps:$4 sm:$0xff]   ;;  %v2920_v19 = vld [vmem:[#allocation2 + $0xa8] ss:$16 sps:$4 sm:$0xff]  }
  0x2f   : > { %1584 = vmatprep.subr.bf16.mxu1 %v2841_v21  ;;  %v2869_v40 = vld [vmem:[#allocation2 + $0x1a4] ss:$16 sps:$4 sm:$0xff]   ;;  %v2873_v42 = vld [vmem:[#allocation2 + $0x1a0] ss:$16 sps:$4 sm:$0xff]   ;;  %v2928_v21 = vld [vmem:[#allocation2 + $0x8c] ss:$16 sps:$4 sm:$0xff]  }
  0x30   : > { %v2871_v41 = vld [vmem:[#allocation2 + $0x3a4] ss:$16 sps:$4 sm:$0xff]   ;;  %v2874_v43 = vld [vmem:[#allocation2 + $0x3a0] ss:$16 sps:$4 sm:$0xff]  }
  0x31   : > { %1544 = vmatpush1.bf16.msra.mxu0 %v2843_v22  ;;  %v2875_v44 = vld [vmem:[#allocation2 + $0x184] ss:$16 sps:$4 sm:$0xff]   ;;  %v2879_v47 = vld [vmem:[#allocation2 + $0x180] ss:$16 sps:$4 sm:$0xff]  }
  0x32   : > { %1585 = vmatpush1.bf16.msra.mxu1 %v2844_v23  ;;  %1545 = vmatprep.subr.bf16.mxu0 %v2845_v24  ;;  %v2877_v45 = vld [vmem:[#allocation2 + $0x384] ss:$16 sps:$4 sm:$0xff]   ;;  %v2880_v48 = vld [vmem:[#allocation2 + $0x380] ss:$16 sps:$4 sm:$0xff]   ;;  %v2926_v23 = vld [vmem:[#allocation2 + $0x88] ss:$16 sps:$4 sm:$0xff]  }
  0x33   : > { %1586 = vmatprep.subr.bf16.mxu1 %v2847_v25  ;;  %v2881_v51 = vld [vmem:[#allocation2 + $0x164] ss:$16 sps:$4 sm:$0xff]   ;;  %v2885_v54 = vld [vmem:[#allocation2 + $0x160] ss:$16 sps:$4 sm:$0xff]   ;;  %v2934_v25 = vld [vmem:[#allocation2 + $0x6c] ss:$16 sps:$4 sm:$0xff]  }
  0x34   : > { %v2883_v53 = vld [vmem:[#allocation2 + $0x364] ss:$16 sps:$4 sm:$0xff]   ;;  %v2886_v55 = vld [vmem:[#allocation2 + $0x360] ss:$16 sps:$4 sm:$0xff]  }
  0x35   : > { %1546 = vmatpush1.bf16.msra.mxu0 %v2849_v26  ;;  %v2887_v56 = vld [vmem:[#allocation2 + $0x144] ss:$16 sps:$4 sm:$0xff]   ;;  %v2891_v58 = vld [vmem:[#allocation2 + $0x140] ss:$16 sps:$4 sm:$0xff]  }
  0x36   : > { %1587 = vmatpush1.bf16.msra.mxu1 %v2850_v27  ;;  %1547 = vmatprep.subr.bf16.mxu0 %v2851_v28  ;;  %v2889_v57 = vld [vmem:[#allocation2 + $0x344] ss:$16 sps:$4 sm:$0xff]   ;;  %v2892_v59 = vld [vmem:[#allocation2 + $0x340] ss:$16 sps:$4 sm:$0xff]   ;;  %v2932_v27 = vld [vmem:[#allocation2 + $0x68] ss:$16 sps:$4 sm:$0xff]  }
  0x37   : > { %1588 = vmatprep.subr.bf16.mxu1 %v2853_v29  ;;  %v2893_v60 = vld [vmem:[#allocation2 + $0x124] ss:$16 sps:$4 sm:$0xff]   ;;  %v2897_v62 = vld [vmem:[#allocation2 + $0x120] ss:$16 sps:$4 sm:$0xff]   ;;  %v2940_v29 = vld [vmem:[#allocation2 + $0x4c] ss:$16 sps:$4 sm:$0xff]  }
  0x38   : > { %v2895_v61 = vld [vmem:[#allocation2 + $0x324] ss:$16 sps:$4 sm:$0xff]   ;;  %v2898_v63 = vld [vmem:[#allocation2 + $0x320] ss:$16 sps:$4 sm:$0xff]  }
  0x39   : > { %1548 = vmatpush1.bf16.msra.mxu0 %v2855_v30  ;;  %v2899_v0 = vld [vmem:[#allocation2 + $0x104] ss:$16 sps:$4 sm:$0xff]   ;;  %v2903_v2 = vld [vmem:[#allocation2 + $0x100] ss:$16 sps:$4 sm:$0xff]  }
  0x3a   : > { %1589 = vmatpush1.bf16.msra.mxu1 %v2856_v31  ;;  %1549 = vmatprep.subr.bf16.mxu0 %v2857_v32  ;;  %v2901_v1 = vld [vmem:[#allocation2 + $0x304] ss:$16 sps:$4 sm:$0xff]   ;;  %v2904_v3 = vld [vmem:[#allocation2 + $0x300] ss:$16 sps:$4 sm:$0xff]   ;;  %v2938_v31 = vld [vmem:[#allocation2 + $0x48] ss:$16 sps:$4 sm:$0xff]  }
  0x3b   : > { %1590 = vmatprep.subr.bf16.mxu1 %v2859_v33  ;;  %v347_v4 = vld [vmem:[%s3274_s22] sm:$0xff]  ;;  %v349_v5 = vld [vmem:[%s3274_s22 + $0x10] sm:$0xff]  ;;  %v2946_v33 = vld [vmem:[#allocation2 + $0x2c] ss:$16 sps:$4 sm:$0xff]  }
  0x3c   : > { %v2907_v6 = vld [vmem:[#allocation2 + $0x4e4] ss:$16 sps:$4 sm:$0xff]   ;;  %v3286_v8 = vpack.c.bf16 %v347_v4, %v347_v4  ;;  %v3288_v9 = vpack.c.bf16 %v349_v5, %v349_v5  ;;  %v2905_v10 = vld [vmem:[#allocation2 + $0x4e0] ss:$16 sps:$4 sm:$0xff]   ;;  %v2994_v4 = vld [vmem:[#allocation2 + $0x12c] ss:$16 sps:$4 sm:$0xff]  }
  0x3d   : > { %1550 = vmatpush2.bf16.msra.mxu0 %v2861_v34  ;;  %v2913_v12 = vld [vmem:[#allocation2 + $0x4c4] ss:$16 sps:$4 sm:$0xff]   ;;  %v2911_v14 = vld [vmem:[#allocation2 + $0x4c0] ss:$16 sps:$4 sm:$0xff]   ;;  %v352_v34 = vld [vmem:[%s3274_s22 + $0x28] sm:$0xff] }
  0x3e   : > { %1591 = vmatpush2.bf16.msra.mxu1 %v2862_v35  ;;  %1551 = vmatprep.subr.bf16.mxu0 %v2863_v36  ;;  %v2919_v16 = vld [vmem:[#allocation2 + $0x4a4] ss:$16 sps:$4 sm:$0xff]   ;;  %v2917_v18 = vld [vmem:[#allocation2 + $0x4a0] ss:$16 sps:$4 sm:$0xff]   ;;  %v3294_v35 = vpack.c.bf16 %v352_v34, %v352_v34  ;;  %v3033_v34 = vld [vmem:[#allocation2 + $0x24c] ss:$16 sps:$4 sm:$0xff]  }
  0x3f   : > { %1592 = vmatprep.subr.bf16.mxu1 %v2865_v37  ;;  %v2925_v20 = vld [vmem:[#allocation2 + $0x484] ss:$16 sps:$4 sm:$0xff]   ;;  %v2923_v22 = vld [vmem:[#allocation2 + $0x480] ss:$16 sps:$4 sm:$0xff]   ;;  %v2944_v37 = vld [vmem:[#allocation2 + $0x28] ss:$16 sps:$4 sm:$0xff]  }
  0x40   : > { %v2931_v24 = vld [vmem:[#allocation2 + $0x464] ss:$16 sps:$4 sm:$0xff]   ;;  %v2929_v26 = vld [vmem:[#allocation2 + $0x460] ss:$16 sps:$4 sm:$0xff]  }
  0x41   : > { %1552 = vmatpush2.bf16.msra.mxu0 %v2867_v38  ;;  %v2937_v28 = vld [vmem:[#allocation2 + $0x444] ss:$16 sps:$4 sm:$0xff]   ;;  %v2935_v30 = vld [vmem:[#allocation2 + $0x440] ss:$16 sps:$4 sm:$0xff]  }
  0x42   : > { %1593 = vmatpush2.bf16.msra.mxu1 %v2868_v39  ;;  %1553 = vmatprep.subr.bf16.mxu0 %v2869_v40  ;;  %v2943_v32 = vld [vmem:[#allocation2 + $0x424] ss:$16 sps:$4 sm:$0xff]   ;;  %v2941_v36 = vld [vmem:[#allocation2 + $0x420] ss:$16 sps:$4 sm:$0xff]   ;;  %v2952_v39 = vld [vmem:[#allocation2 + $0xc] ss:$16 sps:$4 sm:$0xff]  }
  0x43   : > { %1594 = vmatprep.subr.bf16.mxu1 %v2871_v41  ;;  %v2949_v38 = vld [vmem:[#allocation2 + $0x404] ss:$16 sps:$4 sm:$0xff]   ;;  %v2947_v40 = vld [vmem:[#allocation2 + $0x400] ss:$16 sps:$4 sm:$0xff]   ;;  %v2950_v41 = vld [vmem:[#allocation2 + $0x8] ss:$16 sps:$4 sm:$0xff]  }
  0x44   : > { %v2961_v46 = vld [vmem:[#allocation2 + $0x5c4] ss:$16 sps:$4 sm:$0xff]   ;;  %v2989_v5 = vld [vmem:[#allocation2 + $0x520] ss:$16 sps:$4 sm:$0xff]  }
  0x45   : > { %1554 = vmatpush2.bf16.msra.mxu0 %v2873_v42  ;;  %v2955_v42 = vld [vmem:[#allocation2 + $0x5e4] ss:$16 sps:$4 sm:$0xff]  }
  0x46   : > { %1595 = vmatpush2.bf16.msra.mxu1 %v2874_v43  ;;  %1555 = vmatprep.subr.bf16.mxu0 %v2875_v44  ;;  %v2958_v43 = vld [vmem:[#allocation2 + $0x1ec] ss:$16 sps:$4 sm:$0xff]   ;;  %v2953_v44 = vld [vmem:[#allocation2 + $0x5e0] ss:$16 sps:$4 sm:$0xff]   ;;  %v2967_v50 = vld [vmem:[#allocation2 + $0x5a4] ss:$16 sps:$4 sm:$0xff]  }
  0x47   : > { %1596 = vmatprep.subr.bf16.mxu1 %v2877_v45  ;;  %v2956_v45 = vld [vmem:[#allocation2 + $0x1e8] ss:$16 sps:$4 sm:$0xff]  }
  0x49   : > { %1556 = vmatpush2.bf16.msra.mxu0 %v2879_v47  ;;  %v2964_v47 = vld [vmem:[#allocation2 + $0x1cc] ss:$16 sps:$4 sm:$0xff]  }
  0x4a   : > { %1597 = vmatpush2.bf16.msra.mxu1 %v2880_v48  ;;  %1557 = vmatprep.subr.bf16.mxu0 %v2881_v51  ;;  %v2959_v48 = vld [vmem:[#allocation2 + $0x5c0] ss:$16 sps:$4 sm:$0xff]   ;;  %v2970_v51 = vld [vmem:[#allocation2 + $0x1ac] ss:$16 sps:$4 sm:$0xff]  }
  0x4b   : > { %1598 = vmatprep.subr.bf16.mxu1 %v2883_v53  ;;  %v2965_v53 = vld [vmem:[#allocation2 + $0x5a0] ss:$16 sps:$4 sm:$0xff]  }
  0x4d   : > { %1558 = vmatpush2.bf16.msra.mxu0 %v2885_v54  ;;  %v2968_v54 = vld [vmem:[#allocation2 + $0x1a8] ss:$16 sps:$4 sm:$0xff]  }
  0x4e   : > { %1599 = vmatpush2.bf16.msra.mxu1 %v2886_v55  ;;  %1559 = vmatprep.subr.bf16.mxu0 %v2887_v56  ;;  %v2973_v55 = vld [vmem:[#allocation2 + $0x584] ss:$16 sps:$4 sm:$0xff]   ;;  %v2976_v56 = vld [vmem:[#allocation2 + $0x18c] ss:$16 sps:$4 sm:$0xff]  }
  0x4f   : > { %1600 = vmatprep.subr.bf16.mxu1 %v2889_v57  ;;  %v2971_v57 = vld [vmem:[#allocation2 + $0x580] ss:$16 sps:$4 sm:$0xff]  }
  0x51   : > { %1560 = vmatpush2.bf16.msra.mxu0 %v2891_v58  ;;  %v2974_v58 = vld [vmem:[#allocation2 + $0x188] ss:$16 sps:$4 sm:$0xff]  }
  0x52   : > { %1601 = vmatpush2.bf16.msra.mxu1 %v2892_v59  ;;  %1561 = vmatprep.subr.bf16.mxu0 %v2893_v60  ;;  %v2979_v59 = vld [vmem:[#allocation2 + $0x564] ss:$16 sps:$4 sm:$0xff]   ;;  %v2982_v60 = vld [vmem:[#allocation2 + $0x16c] ss:$16 sps:$4 sm:$0xff]  }
  0x53   : > { %1602 = vmatprep.subr.bf16.mxu1 %v2895_v61  ;;  %v2977_v61 = vld [vmem:[#allocation2 + $0x560] ss:$16 sps:$4 sm:$0xff]  }
  0x55   : > { %1562 = vmatpush2.bf16.msra.mxu0 %v2897_v62  ;;  %v2980_v62 = vld [vmem:[#allocation2 + $0x168] ss:$16 sps:$4 sm:$0xff]  }
  0x56   : > { %1603 = vmatpush2.bf16.msra.mxu1 %v2898_v63  ;;  %1563 = vmatprep.subr.bf16.mxu0 %v2899_v0  ;;  %v2985_v63 = vld [vmem:[#allocation2 + $0x544] ss:$16 sps:$4 sm:$0xff]   ;;  %v2988_v0 = vld [vmem:[#allocation2 + $0x14c] ss:$16 sps:$4 sm:$0xff]  }
  0x57   : > { %1604 = vmatprep.subr.bf16.mxu1 %v2901_v1  ;;  %v2983_v1 = vld [vmem:[#allocation2 + $0x540] ss:$16 sps:$4 sm:$0xff]  }
  0x59   : > { %1564 = vmatpush2.bf16.msra.mxu0 %v2903_v2  ;;  %v2986_v2 = vld [vmem:[#allocation2 + $0x148] ss:$16 sps:$4 sm:$0xff]  }
  0x5a   : > { %1605 = vmatpush2.bf16.msra.mxu1 %v2904_v3  ;;  %1615 = vmatprep.subr.bf16.mxu0 %v2907_v6  ;;  %v2991_v3 = vld [vmem:[#allocation2 + $0x524] ss:$16 sps:$4 sm:$0xff]   ;;  %v2992_v6 = vld [vmem:[#allocation2 + $0x128] ss:$16 sps:$4 sm:$0xff]  }
  0x5b   : > { %1656 = vmatprep.subr.bf16.mxu1 %v2910_v7  ;;  %v2997_v7 = vld [vmem:[#allocation2 + $0x504] ss:$16 sps:$4 sm:$0xff]  }
  0x5c   : > { %1566 = vmatmul.mubr.bf16.vlgmr.msra.gmra.mxu0 %v3286_v8 }
  0x5d   : > { %1607 = vmatmul.mubr.bf16.vlgmr.msra.gmra.mxu1 %v3288_v9  ;;  %1616 = vmatpush1.bf16.msra.mxu0 %v2905_v10  ;;  %v3000_v10 = vld [vmem:[#allocation2 + $0x10c] ss:$16 sps:$4 sm:$0xff]  }
  0x5e   : > { %1657 = vmatpush1.bf16.msra.mxu1 %v2908_v11  ;;  %1617 = vmatprep.subr.bf16.mxu0 %v2913_v12  ;;  %v2995_v11 = vld [vmem:[#allocation2 + $0x500] ss:$16 sps:$4 sm:$0xff]   ;;  %v2998_v12 = vld [vmem:[#allocation2 + $0x108] ss:$16 sps:$4 sm:$0xff]  }
  0x5f   : > { %1658 = vmatprep.subr.bf16.mxu1 %v2916_v13  ;;  %1688 = vmatprep.mubr.bf16.mxu1 %v3277_v49  ;;  %v2962_v49 = vld [vmem:[#allocation2 + $0x1c8] ss:$16 sps:$4 sm:$0xff]   ;;  %v351_v13 = vld [vmem:[%s3274_s22 + $0x20] sm:$0xff] }
  0x60   : > { %1647 = vmatprep.mubr.bf16.mxu0 %v3294_v35 }
  0x61   : > { %1618 = vmatpush1.bf16.msra.mxu0 %v2911_v14  ;;  %v3003_v14 = vld [vmem:[#allocation2 + $0x2ec] ss:$16 sps:$4 sm:$0xff]  }
  0x62   : > { %1659 = vmatpush1.bf16.msra.mxu1 %v2914_v15  ;;  %1619 = vmatprep.subr.bf16.mxu0 %v2919_v16  ;;  %v3006_v15 = vld [vmem:[#allocation2 + $0x4ec] ss:$16 sps:$4 sm:$0xff]   ;;  %v3298_v16 = vpack.c.bf16 %v351_v13, %v351_v13 }
  0x63   : > { %1660 = vmatprep.subr.bf16.mxu1 %v2922_v17  ;;  %v3001_v17 = vld [vmem:[#allocation2 + $0x2e8] ss:$16 sps:$4 sm:$0xff]   ;;  %v3096_v13 = vld [vmem:[#allocation2 + $0x50c] ss:$16 sps:$4 sm:$0xff]  }
  0x65   : > { %1620 = vmatpush1.bf16.msra.mxu0 %v2917_v18  ;;  %v3004_v18 = vld [vmem:[#allocation2 + $0x4e8] ss:$16 sps:$4 sm:$0xff]  }
  0x66   : > { %1661 = vmatpush1.bf16.msra.mxu1 %v2920_v19  ;;  %1621 = vmatprep.subr.bf16.mxu0 %v2925_v20  ;;  %v3009_v19 = vld [vmem:[#allocation2 + $0x2cc] ss:$16 sps:$4 sm:$0xff]  }
  0x67   : > { %1662 = vmatprep.subr.bf16.mxu1 %v2928_v21  ;;  %v3012_v20 = vld [vmem:[#allocation2 + $0x4cc] ss:$16 sps:$4 sm:$0xff]   ;;  %v3007_v21 = vld [vmem:[#allocation2 + $0x2c8] ss:$16 sps:$4 sm:$0xff]  }
  0x69   : > { %1622 = vmatpush1.bf16.msra.mxu0 %v2923_v22  ;;  %v3010_v22 = vld [vmem:[#allocation2 + $0x4c8] ss:$16 sps:$4 sm:$0xff]  }
  0x6a   : > { %1663 = vmatpush1.bf16.msra.mxu1 %v2926_v23  ;;  %1623 = vmatprep.subr.bf16.mxu0 %v2931_v24  ;;  %v3015_v23 = vld [vmem:[#allocation2 + $0x2ac] ss:$16 sps:$4 sm:$0xff]  }
  0x6b   : > { %1664 = vmatprep.subr.bf16.mxu1 %v2934_v25  ;;  %v3018_v24 = vld [vmem:[#allocation2 + $0x4ac] ss:$16 sps:$4 sm:$0xff]   ;;  %v3013_v25 = vld [vmem:[#allocation2 + $0x2a8] ss:$16 sps:$4 sm:$0xff]  }
  0x6d   : > { %1624 = vmatpush1.bf16.msra.mxu0 %v2929_v26  ;;  %v3016_v26 = vld [vmem:[#allocation2 + $0x4a8] ss:$16 sps:$4 sm:$0xff]  }
  0x6e   : > { %1665 = vmatpush1.bf16.msra.mxu1 %v2932_v27  ;;  %1625 = vmatprep.subr.bf16.mxu0 %v2937_v28  ;;  %v3021_v27 = vld [vmem:[#allocation2 + $0x28c] ss:$16 sps:$4 sm:$0xff]  }
  0x6f   : > { %1666 = vmatprep.subr.bf16.mxu1 %v2940_v29  ;;  %v3024_v28 = vld [vmem:[#allocation2 + $0x48c] ss:$16 sps:$4 sm:$0xff]   ;;  %v3019_v29 = vld [vmem:[#allocation2 + $0x288] ss:$16 sps:$4 sm:$0xff]  }
  0x71   : > { %1626 = vmatpush1.bf16.msra.mxu0 %v2935_v30  ;;  %v3027_v30 = vld [vmem:[#allocation2 + $0x26c] ss:$16 sps:$4 sm:$0xff]  }
  0x72   : > { %1667 = vmatpush1.bf16.msra.mxu1 %v2938_v31  ;;  %1627 = vmatprep.subr.bf16.mxu0 %v2943_v32  ;;  %v3030_v31 = vld [vmem:[#allocation2 + $0x46c] ss:$16 sps:$4 sm:$0xff]   ;;  %v3025_v32 = vld [vmem:[#allocation2 + $0x268] ss:$16 sps:$4 sm:$0xff]  }
  0x73   : > { %1668 = vmatprep.subr.bf16.mxu1 %v2946_v33  ;;  %v3028_v33 = vld [vmem:[#allocation2 + $0x468] ss:$16 sps:$4 sm:$0xff]  }
  0x75   : > { %1628 = vmatpush1.bf16.msra.mxu0 %v2941_v36  ;;  %v3034_v36 = vld [vmem:[#allocation2 + $0x448] ss:$16 sps:$4 sm:$0xff]  }
  0x76   : > { %1669 = vmatpush1.bf16.msra.mxu1 %v2944_v37  ;;  %1629 = vmatprep.subr.bf16.mxu0 %v2949_v38  ;;  %v3039_v37 = vld [vmem:[#allocation2 + $0x22c] ss:$16 sps:$4 sm:$0xff]  }
  0x77   : > { %1670 = vmatprep.subr.bf16.mxu1 %v2952_v39  ;;  %v3042_v38 = vld [vmem:[#allocation2 + $0x42c] ss:$16 sps:$4 sm:$0xff]   ;;  %v3037_v39 = vld [vmem:[#allocation2 + $0x228] ss:$16 sps:$4 sm:$0xff]  }
  0x79   : > { %1630 = vmatpush1.bf16.msra.mxu0 %v2947_v40  ;;  %v3040_v40 = vld [vmem:[#allocation2 + $0x428] ss:$16 sps:$4 sm:$0xff]  }
  0x7a   : > { %1671 = vmatpush1.bf16.msra.mxu1 %v2950_v41  ;;  %1631 = vmatprep.subr.bf16.mxu0 %v2955_v42  ;;  %v3045_v41 = vld [vmem:[#allocation2 + $0x20c] ss:$16 sps:$4 sm:$0xff]  }
  0x7b   : > { %1672 = vmatprep.subr.bf16.mxu1 %v2958_v43  ;;  %v3048_v42 = vld [vmem:[#allocation2 + $0x40c] ss:$16 sps:$4 sm:$0xff]   ;;  %v3043_v43 = vld [vmem:[#allocation2 + $0x208] ss:$16 sps:$4 sm:$0xff]  }
  0x7d   : > { %1632 = vmatpush2.bf16.msra.mxu0 %v2953_v44  ;;  %v3046_v44 = vld [vmem:[#allocation2 + $0x408] ss:$16 sps:$4 sm:$0xff]  }
  0x7e   : > { %1673 = vmatpush2.bf16.msra.mxu1 %v2956_v45  ;;  %1633 = vmatprep.subr.bf16.mxu0 %v2961_v46  ;;  %v3051_v45 = vld [vmem:[#allocation2 + $0x3ec] ss:$16 sps:$4 sm:$0xff]  }
  0x7f   : > { %1674 = vmatprep.subr.bf16.mxu1 %v2964_v47  ;;  %v3054_v46 = vld [vmem:[#allocation2 + $0x5ec] ss:$16 sps:$4 sm:$0xff]   ;;  %v3049_v47 = vld [vmem:[#allocation2 + $0x3e8] ss:$16 sps:$4 sm:$0xff]  }
  0x81   : > { %1634 = vmatpush2.bf16.msra.mxu0 %v2959_v48  ;;  %v3052_v48 = vld [vmem:[#allocation2 + $0x5e8] ss:$16 sps:$4 sm:$0xff]  }
  0x82   : > { %1675 = vmatpush2.bf16.msra.mxu1 %v2962_v49  ;;  %1635 = vmatprep.subr.bf16.mxu0 %v2967_v50  ;;  %v3057_v49 = vld [vmem:[#allocation2 + $0x3cc] ss:$16 sps:$4 sm:$0xff]  }
  0x83   : > { %1676 = vmatprep.subr.bf16.mxu1 %v2970_v51  ;;  %v3060_v50 = vld [vmem:[#allocation2 + $0x5cc] ss:$16 sps:$4 sm:$0xff]   ;;  %v3055_v51 = vld [vmem:[#allocation2 + $0x3c8] ss:$16 sps:$4 sm:$0xff]  }
  0x85   : > { %1636 = vmatpush2.bf16.msra.mxu0 %v2965_v53  ;;  %v3058_v53 = vld [vmem:[#allocation2 + $0x5c8] ss:$16 sps:$4 sm:$0xff]  }
  0x86   : > { %1677 = vmatpush2.bf16.msra.mxu1 %v2968_v54  ;;  %1637 = vmatprep.subr.bf16.mxu0 %v2973_v55  ;;  %v3063_v54 = vld [vmem:[#allocation2 + $0x3ac] ss:$16 sps:$4 sm:$0xff]  }
  0x87   : > { %1678 = vmatprep.subr.bf16.mxu1 %v2976_v56  ;;  %v3066_v55 = vld [vmem:[#allocation2 + $0x5ac] ss:$16 sps:$4 sm:$0xff]   ;;  %v3061_v56 = vld [vmem:[#allocation2 + $0x3a8] ss:$16 sps:$4 sm:$0xff]  }
  0x89   : > { %1638 = vmatpush2.bf16.msra.mxu0 %v2971_v57  ;;  %v3064_v57 = vld [vmem:[#allocation2 + $0x5a8] ss:$16 sps:$4 sm:$0xff]  }
  0x8a   : > { %1679 = vmatpush2.bf16.msra.mxu1 %v2974_v58  ;;  %1639 = vmatprep.subr.bf16.mxu0 %v2979_v59  ;;  %v3069_v58 = vld [vmem:[#allocation2 + $0x38c] ss:$16 sps:$4 sm:$0xff]  }
  0x8b   : > { %1680 = vmatprep.subr.bf16.mxu1 %v2982_v60  ;;  %v3072_v59 = vld [vmem:[#allocation2 + $0x58c] ss:$16 sps:$4 sm:$0xff]   ;;  %v3067_v60 = vld [vmem:[#allocation2 + $0x388] ss:$16 sps:$4 sm:$0xff]  }
  0x8d   : > { %1640 = vmatpush2.bf16.msra.mxu0 %v2977_v61  ;;  %v3070_v61 = vld [vmem:[#allocation2 + $0x588] ss:$16 sps:$4 sm:$0xff]  }
  0x8e   : > { %1681 = vmatpush2.bf16.msra.mxu1 %v2980_v62  ;;  %1641 = vmatprep.subr.bf16.mxu0 %v2985_v63  ;;  %v3075_v62 = vld [vmem:[#allocation2 + $0x36c] ss:$16 sps:$4 sm:$0xff]  }
  0x8f   : > { %1682 = vmatprep.subr.bf16.mxu1 %v2988_v0  ;;  %v3078_v63 = vld [vmem:[#allocation2 + $0x56c] ss:$16 sps:$4 sm:$0xff]   ;;  %v3073_v0 = vld [vmem:[#allocation2 + $0x368] ss:$16 sps:$4 sm:$0xff]  }
  0x91   : > { %1642 = vmatpush2.bf16.msra.mxu0 %v2983_v1  ;;  %v3076_v1 = vld [vmem:[#allocation2 + $0x568] ss:$16 sps:$4 sm:$0xff]  }
  0x92   : > { %1683 = vmatpush2.bf16.msra.mxu1 %v2986_v2  ;;  %1643 = vmatprep.subr.bf16.mxu0 %v2991_v3  ;;  %v3081_v2 = vld [vmem:[#allocation2 + $0x34c] ss:$16 sps:$4 sm:$0xff]  }
  0x93   : > { %1684 = vmatprep.subr.bf16.mxu1 %v2994_v4  ;;  %v3084_v3 = vld [vmem:[#allocation2 + $0x54c] ss:$16 sps:$4 sm:$0xff]   ;;  %v3079_v4 = vld [vmem:[#allocation2 + $0x348] ss:$16 sps:$4 sm:$0xff]  }
  0x95   : > { %1644 = vmatpush2.bf16.msra.mxu0 %v2989_v5  ;;  %v3082_v5 = vld [vmem:[#allocation2 + $0x548] ss:$16 sps:$4 sm:$0xff]  }
  0x96   : > { %1685 = vmatpush2.bf16.msra.mxu1 %v2992_v6  ;;  %1645 = vmatprep.subr.bf16.mxu0 %v2997_v7  ;;  %v3087_v6 = vld [vmem:[#allocation2 + $0x32c] ss:$16 sps:$4 sm:$0xff]  }
  0x97   : > { %1686 = vmatprep.subr.bf16.mxu1 %v3000_v10  ;;  %v3090_v7 = vld [vmem:[#allocation2 + $0x52c] ss:$16 sps:$4 sm:$0xff]   ;;  %v3085_v10 = vld [vmem:[#allocation2 + $0x328] ss:$16 sps:$4 sm:$0xff]  }
  0x99   : > { %1646 = vmatpush2.bf16.msra.mxu0 %v2995_v11  ;;  %v3088_v11 = vld [vmem:[#allocation2 + $0x528] ss:$16 sps:$4 sm:$0xff]  }
  0x9a   : > { %1687 = vmatpush2.bf16.msra.mxu1 %v2998_v12  ;;  %1697 = vmatprep.subr.bf16.mxu0 %v3003_v14  ;;  %v3093_v12 = vld [vmem:[#allocation2 + $0x30c] ss:$16 sps:$4 sm:$0xff]   ;;  %v3091_v14 = vld [vmem:[#allocation2 + $0x308] ss:$16 sps:$4 sm:$0xff]  }
  0x9b   : > { %1738 = vmatprep.subr.bf16.mxu1 %v3006_v15  ;;  %v3094_v15 = vld [vmem:[#allocation2 + $0x508] ss:$16 sps:$4 sm:$0xff]  }
  0x9c   : > { %1648 = vmatmul.mubr.bf16.vlgmr.msra.gmra.mxu0 %v3298_v16 }
  0x9d   : > { %1689 = vmatmul.mubr.bf16.vlgmr.msra.gmra.mxu1 %v3286_v8  ;;  %1698 = vmatpush1.bf16.msra.mxu0 %v3001_v17  ;;  %v3022_v8 = vld [vmem:[#allocation2 + $0x488] ss:$16 sps:$4 sm:$0xff]  }
  0x9e   : > { %1739 = vmatpush1.bf16.msra.mxu1 %v3004_v18  ;;  %1699 = vmatprep.subr.bf16.mxu0 %v3009_v19  ;;  %v3097_v17 = vld [vmem:[%s3490_s3 + $0x78] sm:$0xff]   ;;  %v3099_v19 = vld [vmem:[%s3490_s3 + $0x70] sm:$0xff]  }
  0x9f   : > { %1740 = vmatprep.subr.bf16.mxu1 %v3012_v20  ;;  %1729 = vmatprep.mubr.bf16.mxu0 %v3280_v52  ;;  %v3036_v52 = vld [vmem:[#allocation2 + $0x44c] ss:$16 sps:$4 sm:$0xff]   ;;  %v3100_v20 = vld [vmem:[%s3490_s3 + $0x30] sm:$0xff]  }
  0xa0   : > { %1770 = vmatprep.mubr.bf16.mxu1 %v3294_v35  ;;  %v3031_v35 = vld [vmem:[#allocation2 + $0x248] ss:$16 sps:$4 sm:$0xff]  }
  0xa1   : > { %1700 = vmatpush1.bf16.msra.mxu0 %v3007_v21  ;;  %v3098_v18 = vld [vmem:[%s3490_s3 + $0x38] sm:$0xff]   ;;  %v3101_v21 = vld [vmem:[%s3490_s3 + $0x68] sm:$0xff]  }
  0xa2   : > { %1741 = vmatpush1.bf16.msra.mxu1 %v3010_v22  ;;  %1701 = vmatprep.subr.bf16.mxu0 %v3015_v23  ;;  %v3102_v22 = vld [vmem:[%s3490_s3 + $0x28] sm:$0xff]   ;;  %v3105_v23 = vld [vmem:[%s3490_s3 + $0x58] sm:$0xff]  }
  0xa3   : > { %1742 = vmatprep.subr.bf16.mxu1 %v3018_v24  ;;  %v3113_v24 = vld [vmem:[%s3490_s3 + $0xf8] sm:$0xff]  }
  0xa5   : > { %1702 = vmatpush1.bf16.msra.mxu0 %v3013_v25  ;;  %v3114_v25 = vld [vmem:[%s3490_s3 + $0xb8] sm:$0xff]  }
  0xa6   : > { %1743 = vmatpush1.bf16.msra.mxu1 %v3016_v26  ;;  %1703 = vmatprep.subr.bf16.mxu0 %v3021_v27  ;;  %v3115_v26 = vld [vmem:[%s3490_s3 + $0xf0] sm:$0xff]   ;;  %v3106_v27 = vld [vmem:[%s3490_s3 + $0x18] sm:$0xff]  }
  0xa7   : > { %1744 = vmatprep.subr.bf16.mxu1 %v3024_v28  ;;  %v3107_v28 = vld [vmem:[%s3490_s3 + $0x50] sm:$0xff]  }
  0xa9   : > { %1704 = vmatpush1.bf16.msra.mxu0 %v3019_v29  ;;  %v3116_v29 = vld [vmem:[%s3490_s3 + $0xb0] sm:$0xff]  }
  0xaa   : > { %1745 = vmatpush1.bf16.msra.mxu1 %v3022_v8  ;;  %1705 = vmatprep.subr.bf16.mxu0 %v3027_v30  ;;  %v3117_v8 = vld [vmem:[%s3490_s3 + $0xe8] sm:$0xff]   ;;  %v3108_v30 = vld [vmem:[%s3490_s3 + $0x10] sm:$0xff]  }
  0xab   : > { %1746 = vmatprep.subr.bf16.mxu1 %v3030_v31  ;;  %v3109_v31 = vld [vmem:[%s3490_s3 + $0x48] sm:$0xff]  }
  0xad   : > { %1706 = vmatpush1.bf16.msra.mxu0 %v3025_v32  ;;  %v3118_v32 = vld [vmem:[%s3490_s3 + $0xa8] sm:$0xff]  }
  0xae   : > { %1747 = vmatpush1.bf16.msra.mxu1 %v3028_v33  ;;  %1707 = vmatprep.subr.bf16.mxu0 %v3033_v34  ;;  %v3119_v33 = vld [vmem:[%s3490_s3 + $0xe0] sm:$0xff]   ;;  %v3110_v34 = vld [vmem:[%s3490_s3 + $0x8] sm:$0xff]  }
  0xaf   : > { %1748 = vmatprep.subr.bf16.mxu1 %v3036_v52  ;;  %v3111_v52 = vld [vmem:[%s3490_s3 + $0x40] sm:$0xff]  }
  0xb1   : > { %1708 = vmatpush1.bf16.msra.mxu0 %v3031_v35  ;;  %v3120_v35 = vld [vmem:[%s3490_s3 + $0xa0] sm:$0xff]  }
  0xb2   : > { %1749 = vmatpush1.bf16.msra.mxu1 %v3034_v36  ;;  %1709 = vmatprep.subr.bf16.mxu0 %v3039_v37  ;;  %v3121_v36 = vld [vmem:[%s3490_s3 + $0xd8] sm:$0xff]   ;;  %v3112_v37 = vld [vmem:[%s3490_s3] sm:$0xff]  }
  0xb3   : > { %1750 = vmatprep.subr.bf16.mxu1 %v3042_v38  ;;  %v3122_v38 = vld [vmem:[%s3490_s3 + $0x98] sm:$0xff]  }
  0xb5   : > { %1710 = vmatpush1.bf16.msra.mxu0 %v3037_v39 }
  0xb6   : > { %1751 = vmatpush1.bf16.msra.mxu1 %v3040_v40  ;;  %1711 = vmatprep.subr.bf16.mxu0 %v3045_v41  ;;  %v3123_v41 = vld [vmem:[%s3490_s3 + $0xd0] sm:$0xff]  }
  0xb7   : > { %1752 = vmatprep.subr.bf16.mxu1 %v3048_v42  ;;  %v3124_v42 = vld [vmem:[%s3490_s3 + $0x90] sm:$0xff]  }
  0xb9   : > { %1712 = vmatpush1.bf16.msra.mxu0 %v3043_v43 }
  0xba   : > { %1753 = vmatpush1.bf16.msra.mxu1 %v3046_v44  ;;  %1713 = vmatprep.subr.bf16.mxu0 %v3051_v45 }
  0xbb   : > { %1754 = vmatprep.subr.bf16.mxu1 %v3054_v46 }
  0xbd   : > { %1714 = vmatpush2.bf16.msra.mxu0 %v3049_v47  ;;  %v3125_v47 = vld [vmem:[%s3490_s3 + $0xc8] sm:$0xff]  }
  0xbe   : > { %1755 = vmatpush2.bf16.msra.mxu1 %v3052_v48  ;;  %1715 = vmatprep.subr.bf16.mxu0 %v3057_v49  ;;  %v3126_v48 = vld [vmem:[%s3490_s3 + $0x88] sm:$0xff]  }
  0xbf   : > { %1756 = vmatprep.subr.bf16.mxu1 %v3060_v50 }
  0xc1   : > { %1716 = vmatpush2.bf16.msra.mxu0 %v3055_v51  ;;  %v3127_v51 = vld [vmem:[%s3490_s3 + $0xc0] sm:$0xff]  }
  0xc2   : > { %1757 = vmatpush2.bf16.msra.mxu1 %v3058_v53  ;;  %1717 = vmatprep.subr.bf16.mxu0 %v3063_v54  ;;  %v3128_v53 = vld [vmem:[%s3490_s3 + $0x80] sm:$0xff]   ;;  %v553_v54 = vlaneseq }
  0xc3   : > { %1758 = vmatprep.subr.bf16.mxu1 %v3066_v55 }
  0xc4   : > { %v554_v55 = vshrl.u32 %v553_v54, 7  ;;  %v3141_v54 = vld [vmem:[%s3494_s7 + $0x18] sm:$0xff]  }
  0xc5   : > { %1718 = vmatpush2.bf16.msra.mxu0 %v3061_v56 }
  0xc6   : > { %1759 = vmatpush2.bf16.msra.mxu1 %v3064_v57  ;;  %1719 = vmatprep.subr.bf16.mxu0 %v3069_v58  ;;  %v555_v56 = vsub.s32 0, %v554_v55  ;;  %v551_v57 = vld [vmem:[%s3489_s2] sm:$0xf]  ;;  %v559_v58 = vsub.s32 1, %v554_v55 }
  0xc7   : > { %1760 = vmatprep.subr.bf16.mxu1 %v3072_v59 }
  0xc8   : > { %v556_v59 = vrot.slane %v551_v57, %v555_v56 }
  0xc9   : > { %1720 = vmatpush2.bf16.msra.mxu0 %v3067_v60  ;;  %v560_v60 = vrot.slane %v551_v57, %v559_v58 }
  0xca   : > { %1761 = vmatpush2.bf16.msra.mxu1 %v3070_v61  ;;  %1721 = vmatprep.subr.bf16.mxu0 %v3075_v62 }
  0xcb   : > { %1762 = vmatprep.subr.bf16.mxu1 %v3078_v63 }
  0xcd   : > { %1722 = vmatpush2.bf16.msra.mxu0 %v3073_v0 }
  0xce   : > { %1763 = vmatpush2.bf16.msra.mxu1 %v3076_v1  ;;  %1723 = vmatprep.subr.bf16.mxu0 %v3081_v2 }
  0xcf   : > { %1764 = vmatprep.subr.bf16.mxu1 %v3084_v3 }
  0xd1   : > { %1724 = vmatpush2.bf16.msra.mxu0 %v3079_v4 }
  0xd2   : > { %1765 = vmatpush2.bf16.msra.mxu1 %v3082_v5  ;;  %1725 = vmatprep.subr.bf16.mxu0 %v3087_v6 }
  0xd3   : > { %1766 = vmatprep.subr.bf16.mxu1 %v3090_v7 }
  0xd5   : > { %1726 = vmatpush2.bf16.msra.mxu0 %v3085_v10 }
  0xd6   : > { %1767 = vmatpush2.bf16.msra.mxu1 %v3088_v11  ;;  %1727 = vmatprep.subr.bf16.mxu0 %v3093_v12 }
  0xd7   : > { %1768 = vmatprep.subr.bf16.mxu1 %v3096_v13 }
  0xd9   : > { %1728 = vmatpush2.bf16.msra.mxu0 %v3091_v14 }
  0xda   : > { %1769 = vmatpush2.bf16.msra.mxu1 %v3094_v15  ;;  %2683 = vmatprep.subr.bf16.mxu0 %v3097_v17 }
  0xdb   : > { %2705 = vmatprep.subr.bf16.mxu1 %v3113_v24 }
  0xdc   : > { %1730 = vmatmul.mubr.bf16.vlgmr.msra.gmra.mxu0 %v3288_v9  ;;  %v3103_v9 = vld [vmem:[%s3490_s3 + $0x60] sm:$0xff]  }
  0xdd   : > { %1771 = vmatmul.mubr.bf16.vlgmr.msra.gmra.mxu1 %v3298_v16  ;;  %2684 = vmatpush3.bf16.msra.mxu0 %v3098_v18  ;;  %v3104_v16 = vld [vmem:[%s3490_s3 + $0x20] sm:$0xff]  }
  0xde   : > { %2685 = vmatprep.subr.bf16.mxu0 %v3099_v19  ;;  %2706 = vmatpush3.bf16.msra.mxu1 %v3114_v25 }
  0xdf   : > { %2707 = vmatprep.subr.bf16.mxu1 %v3115_v26 }
  0xe1   : > { %2686 = vmatpush3.bf16.msra.mxu0 %v3100_v20  ;;  %v563_v20 = vsub.s32 2, %v554_v55 }
  0xe2   : > { %2687 = vmatprep.subr.bf16.mxu0 %v3101_v21  ;;  %2708 = vmatpush3.bf16.msra.mxu1 %v3116_v29  ;;  %v567_v21 = vsub.s32 3, %v554_v55  ;;  %v3142_v55 = vld [vmem:[%s3494_s7 + $0x10] sm:$0xff]  }
  0xe3   : > { %2709 = vmatprep.subr.bf16.mxu1 %v3117_v8 }
  0xe5   : > { %2688 = vmatpush3.bf16.msra.mxu0 %v3102_v22  ;;  %v564_v22 = vrot.slane %v551_v57, %v563_v20 }
  0xe6   : > { %2689 = vmatprep.subr.bf16.mxu0 %v3103_v9  ;;  %2710 = vmatpush3.bf16.msra.mxu1 %v3118_v32  ;;  %v568_v9 = vrot.slane %v551_v57, %v567_v21 }
  0xe7   : > { %2711 = vmatprep.subr.bf16.mxu1 %v3119_v33 }
  0xe9   : > { %2690 = vmatpush3.bf16.msra.mxu0 %v3104_v16 }
  0xea   : > { %2691 = vmatprep.subr.bf16.mxu0 %v3105_v23  ;;  %2712 = vmatpush3.bf16.msra.mxu1 %v3120_v35 }
  0xeb   : > { %2713 = vmatprep.subr.bf16.mxu1 %v3121_v36 }
  0xed   : > { %2692 = vmatpush3.bf16.msra.mxu0 %v3106_v27 }
  0xee   : > { %2693 = vmatprep.subr.bf16.mxu0 %v3107_v28  ;;  %2714 = vmatpush3.bf16.msra.mxu1 %v3122_v38 }
  0xef   : > { %2715 = vmatprep.subr.bf16.mxu1 %v3123_v41  ;;  %v3186_v41 = vmov 0.0  }
  0xf1   : > { %2694 = vmatpush3.bf16.msra.mxu0 %v3108_v30 }
  0xf2   : > { %2695 = vmatprep.subr.bf16.mxu0 %v3109_v31  ;;  %2716 = vmatpush3.bf16.msra.mxu1 %v3124_v42  ;;  %v3130_v42 = vld [vmem:[%s3492_s5 + $0x30] sm:$0xff]  }
  0xf3   : > { %2717 = vmatprep.subr.bf16.mxu1 %v3125_v47  ;;  %v3135_v47 = vld [vmem:[%s3492_s5 + $0x8] sm:$0xff]  }
  0xf5   : > { %2696 = vmatpush3.bf16.msra.mxu0 %v3110_v34 }
  0xf6   : > { %2697 = vmatprep.subr.bf16.mxu0 %v3111_v52  ;;  %2718 = vmatpush3.bf16.msra.mxu1 %v3126_v48  ;;  %v3136_v48 = vld [vmem:[%s3492_s5] sm:$0xff]  }
  0xf7   : > { %2719 = vmatprep.subr.bf16.mxu1 %v3127_v51  ;;  %v3139_v51 = vld [vmem:[%s3494_s7 + $0x28] sm:$0xff]  }
  0xf9   : > { %2698 = vmatpush3.bf16.msra.mxu0 %v3112_v37 }
  0xfa   : > { %2720 = vmatpush3.bf16.msra.mxu1 %v3128_v53  ;;  %2745 = vmatprep.subr.bf16.mxu0 %v3186_v41  ;;  %v3140_v53 = vld [vmem:[%s3494_s7 + $0x20] sm:$0xff]  }
  0xfb   : > { %2765 = vmatprep.subr.bf16.mxu1 %v3186_v41 }
 0x11c   : > { %v1567_v39 = vpop.f32.mrf.mxu0 }
 0x11d   : > { %v1608_v40 = vpop.f32.mrf.mxu1  ;;  %v1568_v61 = vadd.f32 %v1567_v39, %v556_v59 }
 0x11e   : > { %v1569_v43 = vpop.f32.mrf.mxu0 }
 0x11f   : > { %v1610_v44 = vpop.f32.mrf.mxu1  ;;  %v1570_v62 = vadd.f32 %v1569_v43, %v560_v60  ;;  %v1609_v63 = vadd.f32 %v1608_v40, %v1568_v61  ;;  %v3129_v40 = vld [vmem:[%s3492_s5 + $0x38] sm:$0xff]   ;;  %v3131_v43 = vld [vmem:[%s3492_s5 + $0x28] sm:$0xff]   ;;  %v2630_v61 = vld [vmem:[%s3491_s4] ss:$0 sm:$0xff] }
 0x120   : > { %v1571_v45 = vpop.f32.mrf.mxu0 }
 0x121   : > { %v1612_v46 = vpop.f32.mrf.mxu1  ;;  %v1611_v2 = vadd.f32 %v1610_v44, %v1570_v62  ;;  %v3132_v44 = vld [vmem:[%s3492_s5 + $0x20] sm:$0xff]   ;;  %v3133_v45 = vld [vmem:[%s3492_s5 + $0x18] sm:$0xff]  }
 0x122   : > { %v1572_v49 = vpop.f32.mrf.mxu0  ;;  %v3134_v46 = vld [vmem:[%s3492_s5 + $0x10] sm:$0xff]  }
 0x123   : > { %v1613_v50 = vpop.f32.mrf.mxu1  ;;  %v3137_v49 = vld [vmem:[%s3494_s7 + $0x38] sm:$0xff]  }
 0x124   : > { %v3138_v50 = vld [vmem:[%s3494_s7 + $0x30] sm:$0xff]  }
 0x15c   : > { %v1649_v0 = vpop.f32.mrf.mxu0 }
 0x15d   : > { %v1690_v1 = vpop.f32.mrf.mxu1  ;;  %v1650_v3 = vadd.f32 %v1649_v0, %v1609_v63 }
 0x15e   : > { %v1651_v4 = vpop.f32.mrf.mxu0  ;;  %v1691_v16 = vadd.f32 %v1690_v1, %v564_v22  ;;  %v2672_v22 = vld [vmem:[%s3495_s8] ss:$0 sm:$0xff] }
 0x15f   : > { %v1692_v5 = vpop.f32.mrf.mxu1  ;;  %v1779_v6 = vmul.f32 0.01, %v1650_v3  ;;  %v1652_v7 = vadd.f32 %v1651_v4, %v1611_v2 }
 0x160   : > { %v1653_v10 = vpop.f32.mrf.mxu0  ;;  %v1693_v25 = vadd.f32 %v1692_v5, %v568_v9 }
 0x161   : > { %v1694_v11 = vpop.f32.mrf.mxu1  ;;  %v1780_v12 = vmul.f32 0.01, %v1652_v7  ;;  %v1783_v13 = vmax.f32 %v1650_v3, %v1779_v6  ;;  %v3143_v10 = vld [vmem:[%s3494_s7 + $0x8] sm:$0xff]  }
 0x162   : > { %v1654_v14 = vpop.f32.mrf.mxu0  ;;  %v3144_v11 = vld [vmem:[%s3494_s7] sm:$0xff]  }
 0x163   : > { %v1695_v15 = vpop.f32.mrf.mxu1  ;;  %v1784_v17 = vmax.f32 %v1652_v7, %v1780_v12  ;;  %v1787_v19 = vpack.c.bf16 %v1783_v13, %v1783_v13  ;;  %v2663_v12 = vld [vmem:[%s3493_s6] ss:$0 sm:$0xff] }
 0x165   : > { %v1788_v18 = vpack.c.bf16 %v1784_v17, %v1784_v17 }
 0x167   : > { %2086 = vmatprep.mubr.bf16.mxu0 %v1788_v18 }
 0x168   : > { %2087 = vmatmul.mubr.bf16.vlgmr.msra.gmra.mxu0 %v1787_v19 }
 0x169   : > { %2746 = vmatpush3.bf16.msra.mxu0 %v3129_v40  ;;  %2761 = vmatprep.mubr.msk.bf16.mxu0 %vm3187_vm0, %v3186_v41 }
 0x16a   : > { %2747 = vmatprep.subr.bf16.mxu0 %v3186_v41 }
 0x16d   : > { %2748 = vmatpush3.bf16.msra.mxu0 %v3130_v42 }
 0x16e   : > { %2749 = vmatprep.subr.bf16.mxu0 %v3186_v41 }
 0x171   : > { %2750 = vmatpush3.bf16.msra.mxu0 %v3131_v43 }
 0x172   : > { %2751 = vmatprep.subr.bf16.mxu0 %v3186_v41 }
 0x175   : > { %2752 = vmatpush3.bf16.msra.mxu0 %v3132_v44 }
 0x176   : > { %2753 = vmatprep.subr.bf16.mxu0 %v3186_v41 }
 0x179   : > { %2754 = vmatpush3.bf16.msra.mxu0 %v3133_v45 }
 0x17a   : > { %2755 = vmatprep.subr.bf16.mxu0 %v3186_v41 }
 0x17d   : > { %2756 = vmatpush3.bf16.msra.mxu0 %v3134_v46 }
 0x17e   : > { %2757 = vmatprep.subr.bf16.mxu0 %v3186_v41 }
 0x181   : > { %2758 = vmatpush3.bf16.msra.mxu0 %v3135_v47 }
 0x182   : > { %2759 = vmatprep.subr.bf16.mxu0 %v3186_v41 }
 0x185   : > { %2760 = vmatpush3.bf16.msra.mxu0 %v3136_v48 }
 0x19c   : > { %v1731_v23 = vpop.f32.mrf.mxu0 }
 0x19d   : > { %v1772_v24 = vpop.f32.mrf.mxu1  ;;  %v1732_v26 = vadd.f32 %v1731_v23, %v1691_v16 }
 0x19e   : > { %v1733_v27 = vpop.f32.mrf.mxu0 }
 0x19f   : > { %v1774_v28 = vpop.f32.mrf.mxu1  ;;  %v1773_v29 = vadd.f32 %v1772_v24, %v1732_v26  ;;  %v1734_v8 = vadd.f32 %v1733_v27, %v1693_v25 }
 0x1a0   : > { %v1735_v30 = vpop.f32.mrf.mxu0 }
 0x1a1   : > { %v1776_v31 = vpop.f32.mrf.mxu1  ;;  %v1781_v32 = vmul.f32 0.01, %v1773_v29  ;;  %v1775_v33 = vadd.f32 %v1774_v28, %v1734_v8 }
 0x1a2   : > { %v1736_v34 = vpop.f32.mrf.mxu0 }
 0x1a3   : > { %v1777_v52 = vpop.f32.mrf.mxu1  ;;  %v1782_v35 = vmul.f32 0.01, %v1775_v33  ;;  %v1785_v36 = vmax.f32 %v1773_v29, %v1781_v32 }
 0x1a5   : > { %v1786_v37 = vmax.f32 %v1775_v33, %v1782_v35  ;;  %v1789_v39 = vpack.c.bf16 %v1785_v36, %v1785_v36 }
 0x1a7   : > { %v1790_v38 = vpack.c.bf16 %v1786_v37, %v1786_v37 }
 0x1a9   : > { %2126 = vmatprep.mubr.bf16.mxu1 %v1790_v38 }
 0x1aa   : > { %2127 = vmatmul.mubr.bf16.vlgmr.msra.gmra.mxu1 %v1789_v39 }
 0x1ab   : > { %2781 = vmatprep.mubr.msk.bf16.mxu1 %vm3187_vm0, %v3186_v41  ;;  %2766 = vmatpush3.bf16.msra.mxu1 %v3137_v49 }
 0x1ac   : > { %2767 = vmatprep.subr.bf16.mxu1 %v3186_v41 }
 0x1af   : > { %2768 = vmatpush3.bf16.msra.mxu1 %v3138_v50 }
 0x1b0   : > { %2769 = vmatprep.subr.bf16.mxu1 %v3186_v41 }
 0x1b3   : > { %2770 = vmatpush3.bf16.msra.mxu1 %v3139_v51 }
 0x1b4   : > { %2771 = vmatprep.subr.bf16.mxu1 %v3186_v41 }
 0x1b7   : > { %2772 = vmatpush3.bf16.msra.mxu1 %v3140_v53 }
 0x1b8   : > { %2773 = vmatprep.subr.bf16.mxu1 %v3186_v41 }
 0x1bb   : > { %2774 = vmatpush3.bf16.msra.mxu1 %v3141_v54 }
 0x1bc   : > { %2775 = vmatprep.subr.bf16.mxu1 %v3186_v41 }
 0x1bf   : > { %2776 = vmatpush3.bf16.msra.mxu1 %v3142_v55 }
 0x1c0   : > { %2777 = vmatprep.subr.bf16.mxu1 %v3186_v41 }
 0x1c3   : > { %2778 = vmatpush3.bf16.msra.mxu1 %v3143_v10 }
 0x1c4   : > { %2779 = vmatprep.subr.bf16.mxu1 %v3186_v41 }
 0x1c7   : > { %2780 = vmatpush3.bf16.msra.mxu1 %v3144_v11 }
 0x228   : > { %v2699_v56 = vpop.f32.mrf.mxu0 }
 0x22a   : > { %v2700_v57 = vpop.f32.mrf.mxu0 }
 0x22b   : > { %v2701_v58 = vadd.f32 %v2700_v57, %v2699_v56 }
 0x22c   : > { %v2702_v59 = vpop.f32.mrf.mxu0 }
 0x22d   : > { %v2089_v0 = vadd.f32 %v2701_v58, %v2630_v61 }
 0x22e   : > { %v2703_v60 = vpop.f32.mrf.mxu0 }
 0x26a   : > { %v2721_v62 = vpop.f32.mrf.mxu1 }
 0x26c   : > { %v2722_v63 = vpop.f32.mrf.mxu1 }
 0x26d   : > { %v2723_v1 = vadd.f32 %v2722_v63, %v2721_v62 }
 0x26e   : > { %v2724_v2 = vpop.f32.mrf.mxu1 }
 0x26f   : > { %v2129_v3 = vadd.f32 %v2723_v1, %v2089_v0 }
 0x270   : > { %v2725_v4 = vpop.f32.mrf.mxu1 }
 0x271   : > { %v2134_v5 = vmul.f32 0.01, %v2129_v3 }
 0x273   : > { %v2135_v6 = vmax.f32 %v2129_v3, %v2134_v5 }
 0x275   : > { %v2136_v7 = vpack.c.bf16 %v2135_v6, %v2135_v6 }
 0x277   : > { %2762 = vmatmul.mubr.bf16.vlgmr.msra.gmra.mxu0 %v2136_v7 }
 0x337   : > { %v2242_v13 = vpop.f32.mrf.mxu0 }
 0x338   : > { %v2243_v14 = vadd.f32 %v2663_v12, %v2242_v13 }
 0x339   : > { %v2763_v15 = vpop.f32.mrf.mxu0 }
 0x33a   : > { %v2248_v17 = vmul.f32 0.01, %v2243_v14 }
 0x33b   : > { %v2245_v18 = vpop.f32.mrf.mxu0 }
 0x33c   : > { %v2249_v19 = vmax.f32 %v2243_v14, %v2248_v17 }
 0x33d   : > { %v2764_v20 = vpop.f32.mrf.mxu0 }
 0x33e   : > { %v2250_v21 = vpack.c.bf16 %v2249_v19, %v2249_v19 }
 0x340   : > { %2782 = vmatmul.mubr.bf16.vlgmr.msra.gmra.mxu1 %v2250_v21 }
 0x400   : > { %v2356_v9 = vpop.f32.mrf.mxu1 }
 0x401   : > { %v2357_v16 = vadd.f32 %v2672_v22, %v2356_v9 }
 0x402   : > { %v2783_v23 = vpop.f32.mrf.mxu1 }
 0x403   : > { %v2362_v24 = vmax.f32 %v2357_v16, 0.0 }
 0x404   : > { %v2359_v25 = vpop.f32.mrf.mxu1 }
 0x405   : > { %2363 = vst [vmem:[%s345_s16] sm:$0xff] %v2362_v24 }
 0x406   : > { %v2784_v26 = vpop.f32.mrf.mxu1 }
 0x407 PF: > { %s20_s30 = sadd.s32 1, %s3181_s30  }
 0x408   : > { %p17_p1 = scmp.ge.s32.totalorder %s20_s30, 4  }
 0x40a   :  { %19 = sbr.rel (!%p17_p1) target bundleno = 1 (0x1), region = 91 }
 0x40f   :  { %2383 = vsyncpa [#allocation3], 1 }
 0x410   :  { %2385 = vsyncpa [#allocation3 + $0x1], 1 }

</bundles_post_ra>
